<compile_context>
chip_gen: v6e
topology: v6e:2x2x1
jax: 0.10.0
libtpu: 0.0.40
codegen_flags: <defaults>
</compile_context>

<pallas_src>
import functools

import jax
import jax.numpy as jnp
from jax.experimental import pallas as pl
from jax.experimental.pallas import tpu as pltpu


def _round_up(x, m):
    return (x + m - 1) // m * m


def _conv3x3_kernel(x_ref, w_ref, o_ref, *, deltas, off, lout, cin):
    # x_ref: (Cin, Ltot)    zero-padded, channel-major, flattened (n, i, j)
    #                       padded frame; real data occupies lanes
    #                       [off, off + N*Hp*Wp).
    # w_ref: (Cout, 3*9+1)  column 3*t + c holds W[:, c, kh, kw] with
    #                       t = kh*3 + kw; column 27 holds the bias.
    # o_ref: (Cout, Lout)   conv output over the padded frame (border lanes are
    #                       garbage and sliced off by the wrapper); lane-dense.
    w = w_ref[...]
    acc = jnp.zeros(o_ref.shape, jnp.float32)
    for t, d in enumerate(deltas):            # 9 static taps, unrolled at trace
        start = off + d                       # static lane offset (>= 0)
        xs = x_ref[:, start:start + lout]     # (Cin, Lout) shifted slab
        wt = w[:, t * cin:(t + 1) * cin]      # (Cout, Cin)
        acc = acc + jnp.dot(wt, xs, preferred_element_type=jnp.float32)
    bias_col = w[:, 9 * cin:9 * cin + 1]      # (Cout, 1), broadcast over lanes
    o_ref[...] = (acc + bias_col).astype(o_ref.dtype)


@jax.jit
def dummy_model_forward(x_nchw, weight_oihw, bias):
    """Forward pass of DummyModel (Conv2d(3, Cout, kernel_size=3, padding=1)).

    x_nchw      : (N, 3, H, W)    float32  -- PyTorch NCHW convention
    weight_oihw : (Cout, 3, 3, 3) float32  -- PyTorch OIHW conv weight
    bias        : (Cout,)         float32
    returns     : (N, Cout, H, W) float32
    """
    N, Cin, H, W = x_nchw.shape
    Cout = weight_oihw.shape[0]
    Hp, Wp = H + 2, W + 2
    Lreal = N * Hp * Wp                        # flattened padded frame length
    Lout = _round_up(Lreal, 128)               # lane-dense output width
    off = Wp + 1                               # max |tap offset|
    Ltot = _round_up(off + Lout + off, 128)    # input slab width
    # Tap offsets within the flattened padded frame, t = kh*3 + kw.
    deltas = tuple((kh - 1) * Wp + (kw - 1) for kh in range(3) for kw in range(3))

    # ---- light wrapper glue (tiny; fuses into a couple of small copies) -----
    xp = jnp.pad(x_nchw, ((0, 0), (0, 0), (1, 1), (1, 1)))          # (N,Cin,Hp,Wp)
    xflat = jnp.transpose(xp, (1, 0, 2, 3)).reshape(Cin, Lreal)     # (Cin, N*Hp*Wp)
    xext = jnp.pad(xflat, ((0, 0), (off, Ltot - off - Lreal)))      # (Cin, Ltot)
    # weight[co, ci, kh, kw] -> w_taps[co, (kh*3+kw)*Cin + ci]; bias as col 27.
    w_taps = jnp.transpose(weight_oihw, (0, 2, 3, 1)).reshape(Cout, 9 * Cin)
    w2 = jnp.concatenate([w_taps, bias.reshape(Cout, 1)], axis=1)   # (Cout, 28)

    kernel = functools.partial(
        _conv3x3_kernel, deltas=deltas, off=off, lout=Lout, cin=Cin)

    out_flat = pl.pallas_call(
        kernel,
        out_shape=jax.ShapeDtypeStruct((Cout, Lout), x_nchw.dtype),
        grid=(1,),
        in_specs=[
            pl.BlockSpec((Cin, Ltot), lambda i: (0, 0)),
            pl.BlockSpec((Cout, 9 * Cin + 1), lambda i: (0, 0)),
        ],
        out_specs=pl.BlockSpec((Cout, Lout), lambda i: (0, 0)),
        compiler_params=pltpu.CompilerParams(
            dimension_semantics=("arbitrary",),
        ),
    )(xext, w2)

    # Drop the padded-frame border / alignment garbage, back to NCHW.
    out_p = out_flat[:, :Lreal].reshape(Cout, N, Hp, Wp)
    return jnp.transpose(out_p[:, :, 1:H + 1, 1:W + 1], (1, 0, 2, 3))


if __name__ == "__main__":
    # Small shapes consistent with the module: batch=2, in_channels=3 (fixed by
    # the module), spatial=16x16, out_channels=4.
    N, Cin, H, W = 2, 3, 16, 16
    Cout = 4

    key = jax.random.PRNGKey(0)
    kx, kw, kb = jax.random.split(key, 3)

    x = jax.random.normal(kx, (N, Cin, H, W), dtype=jnp.float32)
    # Deterministic parameter init (Conv2d-like uniform fan-in scaling).
    fan_in = Cin * 3 * 3
    bound = 1.0 / (fan_in ** 0.5)
    weight = jax.random.uniform(kw, (Cout, Cin, 3, 3), jnp.float32, -bound, bound)
    bias = jax.random.uniform(kb, (Cout,), jnp.float32, -bound, bound)

    out = dummy_model_forward(x, weight, bias)
    out = jax.block_until_ready(out)
    assert out.shape == (N, Cout, H, W), out.shape

    # Sanity check against XLA's conv (same-padding, NCHW/OIHW).
    ref = jax.lax.conv_general_dilated(
        x, weight, window_strides=(1, 1), padding="SAME",
        dimension_numbers=("NCHW", "OIHW", "NCHW"),
    ) + bias.reshape(1, Cout, 1, 1)
    assert jnp.allclose(out, ref, atol=1e-4, rtol=1e-4)

    print("KERNEL_OK")
</pallas_src>

<mosaic_0001>
module attributes {stable_mosaic.version = 11 : i64} {
  func.func @_conv3x3_kernel(%arg0: i32, %arg1: memref<3x896xf32, #tpu.memory_space<vmem>>, %arg2: memref<4x28xf32, #tpu.memory_space<vmem>>, %arg3: memref<4x768xf32, #tpu.memory_space<vmem>>) attributes {dimension_semantics = [#tpu.dimension_semantics<arbitrary>], iteration_bounds = array<i64: 1>, scalar_prefetch = 0 : i64, scratch_operands = 0 : i64, tpu.core_type = #tpu.core_type<tc>, window_params = [{pipeline_mode = #tpu.pipeline_mode<synchronous>, transform_indices = @transform_0, window_bounds = array<i64: 3, 896>}, {pipeline_mode = #tpu.pipeline_mode<synchronous>, transform_indices = @transform_1, window_bounds = array<i64: 4, 28>}, {pipeline_mode = #tpu.pipeline_mode<synchronous>, transform_indices = @transform_2, window_bounds = array<i64: 4, 768>}]} {
    %c0 = arith.constant 0 : index
    %c0_0 = arith.constant 0 : index
    %0 = vector.load %arg2[%c0, %c0_0] : memref<4x28xf32, #tpu.memory_space<vmem>>, vector<4x28xf32>
    %cst = arith.constant 0.000000e+00 : f32
    %1 = vector.broadcast %cst : f32 to vector<4x768xf32>
    %c0_1 = arith.constant 0 : index
    %c0_2 = arith.constant 0 : index
    %2 = vector.load %arg1[%c0_1, %c0_2] : memref<3x896xf32, #tpu.memory_space<vmem>>, vector<3x768xf32>
    %3 = vector.extract_strided_slice %0 {offsets = [0, 0], sizes = [4, 3], strides = [1, 1]} : vector<4x28xf32> to vector<4x3xf32>
    %cst_3 = arith.constant dense<0.000000e+00> : vector<4x768xf32>
    %4 = tpu.matmul %3, %2, %cst_3 {dimension_numbers = #tpu.dot_dimension_numbers<[1], [0], [0], [1], [0, 0, 1, 1], [], []>} : vector<4x3xf32>, vector<3x768xf32>, vector<4x768xf32> -> vector<4x768xf32>
    %5 = arith.addf %1, %4 : vector<4x768xf32>
    %c0_4 = arith.constant 0 : index
    %c1 = arith.constant 1 : index
    %6 = vector.load %arg1[%c0_4, %c1] : memref<3x896xf32, #tpu.memory_space<vmem>>, vector<3x768xf32>
    %7 = vector.extract_strided_slice %0 {offsets = [0, 3], sizes = [4, 3], strides = [1, 1]} : vector<4x28xf32> to vector<4x3xf32>
    %cst_5 = arith.constant dense<0.000000e+00> : vector<4x768xf32>
    %8 = tpu.matmul %7, %6, %cst_5 {dimension_numbers = #tpu.dot_dimension_numbers<[1], [0], [0], [1], [0, 0, 1, 1], [], []>} : vector<4x3xf32>, vector<3x768xf32>, vector<4x768xf32> -> vector<4x768xf32>
    %9 = arith.addf %5, %8 : vector<4x768xf32>
    %c0_6 = arith.constant 0 : index
    %c2 = arith.constant 2 : index
    %10 = vector.load %arg1[%c0_6, %c2] : memref<3x896xf32, #tpu.memory_space<vmem>>, vector<3x768xf32>
    %11 = vector.extract_strided_slice %0 {offsets = [0, 6], sizes = [4, 3], strides = [1, 1]} : vector<4x28xf32> to vector<4x3xf32>
    %cst_7 = arith.constant dense<0.000000e+00> : vector<4x768xf32>
    %12 = tpu.matmul %11, %10, %cst_7 {dimension_numbers = #tpu.dot_dimension_numbers<[1], [0], [0], [1], [0, 0, 1, 1], [], []>} : vector<4x3xf32>, vector<3x768xf32>, vector<4x768xf32> -> vector<4x768xf32>
    %13 = arith.addf %9, %12 : vector<4x768xf32>
    %c0_8 = arith.constant 0 : index
    %c18 = arith.constant 18 : index
    %14 = vector.load %arg1[%c0_8, %c18] : memref<3x896xf32, #tpu.memory_space<vmem>>, vector<3x768xf32>
    %15 = vector.extract_strided_slice %0 {offsets = [0, 9], sizes = [4, 3], strides = [1, 1]} : vector<4x28xf32> to vector<4x3xf32>
    %cst_9 = arith.constant dense<0.000000e+00> : vector<4x768xf32>
    %16 = tpu.matmul %15, %14, %cst_9 {dimension_numbers = #tpu.dot_dimension_numbers<[1], [0], [0], [1], [0, 0, 1, 1], [], []>} : vector<4x3xf32>, vector<3x768xf32>, vector<4x768xf32> -> vector<4x768xf32>
    %17 = arith.addf %13, %16 : vector<4x768xf32>
    %c0_10 = arith.constant 0 : index
    %c19 = arith.constant 19 : index
    %18 = vector.load %arg1[%c0_10, %c19] : memref<3x896xf32, #tpu.memory_space<vmem>>, vector<3x768xf32>
    %19 = vector.extract_strided_slice %0 {offsets = [0, 12], sizes = [4, 3], strides = [1, 1]} : vector<4x28xf32> to vector<4x3xf32>
    %cst_11 = arith.constant dense<0.000000e+00> : vector<4x768xf32>
    %20 = tpu.matmul %19, %18, %cst_11 {dimension_numbers = #tpu.dot_dimension_numbers<[1], [0], [0], [1], [0, 0, 1, 1], [], []>} : vector<4x3xf32>, vector<3x768xf32>, vector<4x768xf32> -> vector<4x768xf32>
    %21 = arith.addf %17, %20 : vector<4x768xf32>
    %c0_12 = arith.constant 0 : index
    %c20 = arith.constant 20 : index
    %22 = vector.load %arg1[%c0_12, %c20] : memref<3x896xf32, #tpu.memory_space<vmem>>, vector<3x768xf32>
    %23 = vector.extract_strided_slice %0 {offsets = [0, 15], sizes = [4, 3], strides = [1, 1]} : vector<4x28xf32> to vector<4x3xf32>
    %cst_13 = arith.constant dense<0.000000e+00> : vector<4x768xf32>
    %24 = tpu.matmul %23, %22, %cst_13 {dimension_numbers = #tpu.dot_dimension_numbers<[1], [0], [0], [1], [0, 0, 1, 1], [], []>} : vector<4x3xf32>, vector<3x768xf32>, vector<4x768xf32> -> vector<4x768xf32>
    %25 = arith.addf %21, %24 : vector<4x768xf32>
    %c0_14 = arith.constant 0 : index
    %c36 = arith.constant 36 : index
    %26 = vector.load %arg1[%c0_14, %c36] : memref<3x896xf32, #tpu.memory_space<vmem>>, vector<3x768xf32>
    %27 = vector.extract_strided_slice %0 {offsets = [0, 18], sizes = [4, 3], strides = [1, 1]} : vector<4x28xf32> to vector<4x3xf32>
    %cst_15 = arith.constant dense<0.000000e+00> : vector<4x768xf32>
    %28 = tpu.matmul %27, %26, %cst_15 {dimension_numbers = #tpu.dot_dimension_numbers<[1], [0], [0], [1], [0, 0, 1, 1], [], []>} : vector<4x3xf32>, vector<3x768xf32>, vector<4x768xf32> -> vector<4x768xf32>
    %29 = arith.addf %25, %28 : vector<4x768xf32>
    %c0_16 = arith.constant 0 : index
    %c37 = arith.constant 37 : index
    %30 = vector.load %arg1[%c0_16, %c37] : memref<3x896xf32, #tpu.memory_space<vmem>>, vector<3x768xf32>
    %31 = vector.extract_strided_slice %0 {offsets = [0, 21], sizes = [4, 3], strides = [1, 1]} : vector<4x28xf32> to vector<4x3xf32>
    %cst_17 = arith.constant dense<0.000000e+00> : vector<4x768xf32>
    %32 = tpu.matmul %31, %30, %cst_17 {dimension_numbers = #tpu.dot_dimension_numbers<[1], [0], [0], [1], [0, 0, 1, 1], [], []>} : vector<4x3xf32>, vector<3x768xf32>, vector<4x768xf32> -> vector<4x768xf32>
    %33 = arith.addf %29, %32 : vector<4x768xf32>
    %c0_18 = arith.constant 0 : index
    %c38 = arith.constant 38 : index
    %34 = vector.load %arg1[%c0_18, %c38] : memref<3x896xf32, #tpu.memory_space<vmem>>, vector<3x768xf32>
    %35 = vector.extract_strided_slice %0 {offsets = [0, 24], sizes = [4, 3], strides = [1, 1]} : vector<4x28xf32> to vector<4x3xf32>
    %cst_19 = arith.constant dense<0.000000e+00> : vector<4x768xf32>
    %36 = tpu.matmul %35, %34, %cst_19 {dimension_numbers = #tpu.dot_dimension_numbers<[1], [0], [0], [1], [0, 0, 1, 1], [], []>} : vector<4x3xf32>, vector<3x768xf32>, vector<4x768xf32> -> vector<4x768xf32>
    %37 = arith.addf %33, %36 : vector<4x768xf32>
    %38 = vector.extract_strided_slice %0 {offsets = [0, 27], sizes = [4, 1], strides = [1, 1]} : vector<4x28xf32> to vector<4x1xf32>
    %39 = vector.broadcast %38 : vector<4x1xf32> to vector<4x768xf32>
    %40 = arith.addf %37, %39 : vector<4x768xf32>
    %c0_20 = arith.constant 0 : index
    %c0_21 = arith.constant 0 : index
    %41 = vector.load %arg3[%c0_20, %c0_21] : memref<4x768xf32, #tpu.memory_space<vmem>>, vector<4x768xf32>
    tpu.vector_store %arg3[%c0_20, %c0_21], %40 {strides = array<i32>} : memref<4x768xf32, #tpu.memory_space<vmem>>, vector<4x768xf32>,
    return
  }
  func.func @transform_0(%arg0: i32) -> (i32, i32) {
    %c0_i32 = arith.constant 0 : i32
    %c0_i32_0 = arith.constant 0 : i32
    %c0_i32_1 = arith.constant 0 : i32
    return %c0_i32, %c0_i32_0 : i32, i32
  }
  func.func @transform_1(%arg0: i32) -> (i32, i32) {
    %c0_i32 = arith.constant 0 : i32
    %c0_i32_0 = arith.constant 0 : i32
    %c0_i32_1 = arith.constant 0 : i32
    return %c0_i32, %c0_i32_0 : i32, i32
  }
  func.func @transform_2(%arg0: i32) -> (i32, i32) {
    %c0_i32 = arith.constant 0 : i32
    %c0_i32_0 = arith.constant 0 : i32
    %c0_i32_1 = arith.constant 0 : i32
    return %c0_i32, %c0_i32_0 : i32, i32
  }
}

</mosaic_0001>

<bundles_post_ra>
// kernel: dummy_model_forward.1
= control target key start
LH: loop header
LB: loop body
LE: loop exit
PB: predicated region body
PF: predicated region fallthrough
CT: control target
= control target key end

     0   :  { %v2524_v2 = vmov 0.0   ;;  %s2525_s13 = smov 127   ;;  %s2526_s16 = smov 125   ;;  %v2539_v56 = vmov 27   ;;  %vm40_vm0 = vcmask 1039360   ;;  %vm50_vm1 = vcmask 1042432   ;;  %s2879_s0 = inlined_call_operand.vmem [shape: f32[3,896], index: 0, kind: input, shape index: {}]   ;;  %s2880_s1 = inlined_call_operand.vmem [shape: f32[4,28], index: 1, kind: input, shape index: {}]   ;;  %s2881_s2 = inlined_call_operand.vmem [shape: f32[4,768], index: 2, kind: output, shape index: {}]  }
   0x1   :  { %v2559_v0 = vld [vmem:[%s2879_s0 + $0x8] sm:$0x77]  ;;  %v2564_v1 = vld [vmem:[%s2879_s0] sm:$0x77]  ;;  %127 = vmatprep.mubr.f32.mxu0 %v2524_v2  ;;  %198 = vmatprep.mubr.f32.mxu1 %v2524_v2  ;;  %v2588_v6 = vld [vmem:[%s2879_s0 + $0x10] sm:$0x77] }
   0x2   :  { %30 = vrot.lane.b32.xlu0 %v2559_v0, %s2525_s13  ;;  %26 = vrot.lane.b32.xlu1 %v2564_v1, %s2525_s13  ;;  %v2572_v3 = vcombine.high %v2564_v1, %v2564_v1  ;;  %v2577_v4 = vld [vmem:[%s2880_s1] sm:$0xf]  ;;  %v2583_v5 = vcombine.high %v2559_v0, %v2559_v0  ;;  %v2594_v7 = vcombine.high %v2588_v6, %v2588_v6  ;;  %v15_v8 = vld [vmem:[%s2879_s0 + $0x18] sm:$0x7]  ;;  %s2527_s24 = smov 126   ;;  %s2528_s25 = smov 122  }
   0x3   :  { %v503_v9 = vld [vmem:[%s2879_s0] sm:$0x77]  ;;  %v504_v11 = vld [vmem:[%s2879_s0 + $0x8] sm:$0x77]  ;;  %v505_v13 = vld [vmem:[%s2879_s0 + $0x10] sm:$0x77]  ;;  %2499 = vset.pattern.permute.xlu0 %v2539_v56 }
   0x4   :  { %v513_v10 = vcombine.high %v503_v9, %v503_v9  ;;  %v514_v12 = vcombine.high %v504_v11, %v504_v11  ;;  %v515_v14 = vcombine.high %v505_v13, %v505_v13  ;;  %v506_v15 = vld [vmem:[%s2879_s0 + $0x18] sm:$0x7]  ;;  %v770_v16 = vld [vmem:[%s2879_s0] sm:$0x77]  ;;  %v771_v18 = vld [vmem:[%s2879_s0 + $0x8] sm:$0x77] }
   0x5   :  { %v780_v17 = vcombine.high %v770_v16, %v770_v16  ;;  %v781_v19 = vcombine.high %v771_v18, %v771_v18  ;;  %s2529_s6 = smov 110   ;;  %v772_v20 = vld [vmem:[%s2879_s0 + $0x10] sm:$0x77]  ;;  %s2530_s9 = smov 119   ;;  %v773_v22 = vld [vmem:[%s2879_s0 + $0x18] sm:$0x7] }
   0x6   :  { %17 = vrot.lane.b32.xlu1 %v2577_v4, %s2526_s16  ;;  %28 = vrot.lane.b32.xlu0 %v2572_v3, %s2525_s13  ;;  %v782_v21 = vcombine.high %v772_v20, %v772_v20  ;;  %v1037_v23 = vld [vmem:[%s2879_s0] sm:$0x77]  ;;  %v1038_v25 = vld [vmem:[%s2879_s0 + $0x8] sm:$0x77]  ;;  %s2531_s16 = smov 109   ;;  %s2532_s17 = smov 116  }
   0x7   :  { %v1047_v24 = vcombine.high %v1037_v23, %v1037_v23  ;;  %v1048_v26 = vcombine.high %v1038_v25, %v1038_v25  ;;  %v1039_v27 = vld [vmem:[%s2879_s0 + $0x10] sm:$0x77]  ;;  %v1040_v29 = vld [vmem:[%s2879_s0 + $0x18] sm:$0x7]  ;;  %v1304_v30 = vld [vmem:[%s2879_s0] sm:$0x77] }
   0x8   :  { %v1049_v28 = vcombine.high %v1039_v27, %v1039_v27  ;;  %v1314_v31 = vcombine.high %v1304_v30, %v1304_v30  ;;  %v1305_v32 = vld [vmem:[%s2879_s0 + $0x8] sm:$0x77]  ;;  %v1306_v34 = vld [vmem:[%s2879_s0 + $0x10] sm:$0x77]  ;;  %s2534_s28 = smov 113   ;;  %s2535_s8 = smov 92  }
   0x9   :  { %v1315_v33 = vcombine.high %v1305_v32, %v1305_v32  ;;  %v1316_v35 = vcombine.high %v1306_v34, %v1306_v34  ;;  %v1307_v36 = vld [vmem:[%s2879_s0 + $0x18] sm:$0x7]  ;;  %v1571_v37 = vld [vmem:[%s2879_s0] sm:$0x77]  ;;  %v1572_v39 = vld [vmem:[%s2879_s0 + $0x8] sm:$0x77] }
   0xa   :  { %34 = vrot.lane.b32.xlu1 %v2588_v6, %s2525_s13  ;;  %32 = vrot.lane.b32.xlu0 %v2583_v5, %s2525_s13  ;;  %v1581_v38 = vcombine.high %v1571_v37, %v1571_v37  ;;  %v1582_v40 = vcombine.high %v1572_v39, %v1572_v39  ;;  %v1573_v41 = vld [vmem:[%s2879_s0 + $0x10] sm:$0x77]  ;;  %v1574_v43 = vld [vmem:[%s2879_s0 + $0x18] sm:$0x7]  ;;  %s2537_s1 = smov 107   ;;  %s2540_s26 = smov 104  }
   0xb   :  { %v1583_v42 = vcombine.high %v1573_v41, %v1573_v41  ;;  %v1838_v44 = vld [vmem:[%s2879_s0] sm:$0x77]  ;;  %v1839_v46 = vld [vmem:[%s2879_s0 + $0x8] sm:$0x77]  ;;  %v1840_v48 = vld [vmem:[%s2879_s0 + $0x10] sm:$0x77] }
   0xc   :  { %v1848_v45 = vcombine.high %v1838_v44, %v1838_v44  ;;  %v1849_v47 = vcombine.high %v1839_v46, %v1839_v46  ;;  %v1850_v49 = vcombine.high %v1840_v48, %v1840_v48  ;;  %v1841_v50 = vld [vmem:[%s2879_s0 + $0x18] sm:$0x7]  ;;  %v2105_v51 = vld [vmem:[%s2879_s0] sm:$0x77]  ;;  %v2106_v53 = vld [vmem:[%s2879_s0 + $0x8] sm:$0x77] }
   0xd   :  { %v2115_v52 = vcombine.high %v2105_v51, %v2105_v51  ;;  %v2116_v57 = vcombine.high %v2106_v53, %v2106_v53  ;;  %v2107_v58 = vld [vmem:[%s2879_s0 + $0x10] sm:$0x77]  ;;  %vm47_vm2 = vcmask 23552   ;;  %vm530_vm3 = vcmask 1031168  }
   0xe   :  { %38 = vrot.lane.b32.xlu1 %v15_v8, %s2525_s13  ;;  %36 = vrot.lane.b32.xlu0 %v2594_v7, %s2525_s13  ;;  %v2117_v63 = vcombine.high %v2107_v58, %v2107_v58  ;;  %v2108_v8 = vld [vmem:[%s2879_s0 + $0x18] sm:$0x7]  ;;  %vm797_vm4 = vcmask 900096   ;;  %vm1064_vm5 = vcmask 891904   ;;  %vm1331_vm6 = vcmask 883712  }
   0xf   :  { %vm1598_vm7 = vcmask 752640   ;;  %vm1865_vm8 = vcmask 744448   ;;  %vm2132_vm9 = vcmask 736256  }
  0x12   :  { %520 = vrot.lane.b32.xlu1 %v504_v11, %s2527_s24  ;;  %518 = vrot.lane.b32.xlu0 %v513_v10, %s2527_s24 }
  0x16   :  { %507 = vrot.lane.b32.xlu1 %v2577_v4, %s2528_s25  ;;  %516 = vrot.lane.b32.xlu0 %v503_v9, %s2527_s24  ;;  %s2533_s25 = smov 108  }
  0x1a   :  { %524 = vrot.lane.b32.xlu1 %v505_v13, %s2527_s24  ;;  %522 = vrot.lane.b32.xlu0 %v514_v12, %s2527_s24 }
  0x1e   :  { %528 = vrot.lane.b32.xlu1 %v506_v15, %s2527_s24  ;;  %526 = vrot.lane.b32.xlu0 %v515_v14, %s2527_s24 }
  0x22   :  { %787 = vrot.lane.b32.xlu1 %v771_v18, %s2529_s6  ;;  %785 = vrot.lane.b32.xlu0 %v780_v17, %s2529_s6 }
  0x26   :  { %791 = vrot.lane.b32.xlu1 %v772_v20, %s2529_s6  ;;  %789 = vrot.lane.b32.xlu0 %v781_v19, %s2529_s6 }
  0x2a   :  { %774 = vrot.lane.b32.xlu1 %v2577_v4, %s2530_s9  ;;  %783 = vrot.lane.b32.xlu0 %v770_v16, %s2529_s6 }
  0x2e   :  { %795 = vrot.lane.b32.xlu1 %v773_v22, %s2529_s6  ;;  %793 = vrot.lane.b32.xlu0 %v782_v21, %s2529_s6 }
  0x32   :  { %1054 = vrot.lane.b32.xlu1 %v1038_v25, %s2531_s16  ;;  %1052 = vrot.lane.b32.xlu0 %v1047_v24, %s2531_s16 }
  0x36   :  { %1041 = vrot.lane.b32.xlu1 %v2577_v4, %s2532_s17  ;;  %1050 = vrot.lane.b32.xlu0 %v1037_v23, %s2531_s16 }
  0x3a   :  { %1058 = vrot.lane.b32.xlu1 %v1039_v27, %s2531_s16  ;;  %1056 = vrot.lane.b32.xlu0 %v1048_v26, %s2531_s16 }
  0x3e   :  { %1062 = vrot.lane.b32.xlu1 %v1040_v29, %s2531_s16  ;;  %1060 = vrot.lane.b32.xlu0 %v1049_v28, %s2531_s16  ;;  %s2536_s16 = smov 91  }
  0x42   :  { %1321 = vrot.lane.b32.xlu1 %v1305_v32, %s2533_s25  ;;  %1319 = vrot.lane.b32.xlu0 %v1314_v31, %s2533_s25 }
  0x46   :  { %1325 = vrot.lane.b32.xlu1 %v1306_v34, %s2533_s25  ;;  %1323 = vrot.lane.b32.xlu0 %v1315_v33, %s2533_s25 }
  0x4a   :  { %1308 = vrot.lane.b32.xlu1 %v2577_v4, %s2534_s28  ;;  %1317 = vrot.lane.b32.xlu0 %v1304_v30, %s2533_s25 }
  0x4e   :  { %1329 = vrot.lane.b32.xlu1 %v1307_v36, %s2533_s25  ;;  %1327 = vrot.lane.b32.xlu0 %v1316_v35, %s2533_s25  ;;  %s2538_s25 = smov 90  }
  0x52   :  { %1588 = vrot.lane.b32.xlu1 %v1572_v39, %s2535_s8  ;;  %1586 = vrot.lane.b32.xlu0 %v1581_v38, %s2535_s8 }
  0x56   :  { %1575 = vrot.lane.b32.xlu1 %v2577_v4, %s2529_s6  ;;  %1584 = vrot.lane.b32.xlu0 %v1571_v37, %s2535_s8 }
  0x5a   :  { %1592 = vrot.lane.b32.xlu1 %v1573_v41, %s2535_s8  ;;  %1590 = vrot.lane.b32.xlu0 %v1582_v40, %s2535_s8 }
  0x5e   :  { %1596 = vrot.lane.b32.xlu1 %v1574_v43, %s2535_s8  ;;  %1594 = vrot.lane.b32.xlu0 %v1583_v42, %s2535_s8 }
  0x62   :  { %1855 = vrot.lane.b32.xlu1 %v1839_v46, %s2536_s16  ;;  %1853 = vrot.lane.b32.xlu0 %v1848_v45, %s2536_s16 }
  0x66   :  { %1859 = vrot.lane.b32.xlu1 %v1840_v48, %s2536_s16  ;;  %1857 = vrot.lane.b32.xlu0 %v1849_v47, %s2536_s16 }
  0x6a   :  { %1842 = vrot.lane.b32.xlu1 %v2577_v4, %s2537_s1  ;;  %1851 = vrot.lane.b32.xlu0 %v1838_v44, %s2536_s16 }
  0x6e   :  { %1863 = vrot.lane.b32.xlu1 %v1841_v50, %s2536_s16  ;;  %1861 = vrot.lane.b32.xlu0 %v1850_v49, %s2536_s16 }
  0x72   :  { %2122 = vrot.lane.b32.xlu1 %v2106_v53, %s2538_s25  ;;  %2120 = vrot.lane.b32.xlu0 %v2115_v52, %s2538_s25 }
  0x74   :  { %v31_v54 = vpop.permute.xlu0 %30  ;;  %v27_v55 = vpop.permute.xlu1 %26 }
  0x76   :  { %2109 = vrot.lane.b32.xlu1 %v2577_v4, %s2540_s26  ;;  %2118 = vrot.lane.b32.xlu0 %v2105_v51, %s2538_s25 }
  0x78   :  { %v18_v59 = vpop.permute.xlu1 %17  ;;  %v29_v60 = vpop.permute.xlu0 %28 }
  0x79   :  { %v42_v61 = vsel %vm40_vm0, %v29_v60, %v31_v54  ;;  %v41_v62 = vsel %vm40_vm0, %v27_v55, %v29_v60 }
  0x7a   :  { %2126 = vrot.lane.b32.xlu1 %v2107_v58, %s2538_s25  ;;  %2124 = vrot.lane.b32.xlu0 %v2116_v57, %s2538_s25 }
  0x7b   :  { %2401 = vmatprep.subr.msk.mxu0 %vm50_vm1, %v42_v61 }
  0x7c   :  { %2402 = vmatpush1.msk.msra.mxu0 %vm50_vm1, %v41_v62  ;;  %v35_v9 = vpop.permute.xlu1 %34  ;;  %v33_v10 = vpop.permute.xlu0 %32 }
  0x7d   :  { %2403 = vmatmul.mubr.msk.f32.vlgmr.msra.gmra.mxu0 %vm47_vm2, %v18_v59  ;;  %v44_v11 = vsel %vm40_vm0, %v33_v10, %v35_v9  ;;  %v43_v12 = vsel %vm40_vm0, %v31_v54, %v33_v10 }
  0x7e   :  { %2130 = vrot.lane.b32.xlu1 %v2108_v8, %s2538_s25  ;;  %2128 = vrot.lane.b32.xlu0 %v2117_v63, %s2538_s25 }
  0x7f   :  { %2404 = vmatprep.subr.msk.mxu1 %vm50_vm1, %v44_v11  ;;  %269 = vmatprep.mubr.f32.mxu0 %v2524_v2 }
  0x80   :  { %2405 = vmatpush1.msk.msra.mxu1 %vm50_vm1, %v43_v12  ;;  %v39_v13 = vpop.permute.xlu1 %38  ;;  %v37_v14 = vpop.permute.xlu0 %36 }
  0x81   :  { %2406 = vmatmul.mubr.msk.f32.vlgmr.msra.gmra.mxu1 %vm47_vm2, %v18_v59  ;;  %v45_v15 = vsel %vm40_vm0, %v35_v9, %v37_v14  ;;  %v46_v16 = vsel %vm40_vm0, %v37_v14, %v39_v13  ;;  %2410 = vmatprep.subr.msk.mxu1 %vm50_vm1, %v2572_v3 }
  0x82   :  { %2407 = vmatprep.subr.msk.mxu0 %vm50_vm1, %v46_v16  ;;  %2411 = vmatpush1.msk.msra.mxu1 %vm50_vm1, %v2564_v1 }
  0x83   :  { %2408 = vmatpush1.msk.msra.mxu0 %vm50_vm1, %v45_v15  ;;  %354 = vmatprep.mubr.f32.mxu1 %v2524_v2 }
  0x84   :  { %v521_v17 = vpop.permute.xlu1 %520  ;;  %2409 = vmatmul.mubr.msk.f32.vlgmr.msra.gmra.mxu0 %vm47_vm2, %v18_v59  ;;  %2413 = vmatprep.subr.msk.mxu0 %vm50_vm1, %v2583_v5  ;;  %v519_v18 = vpop.permute.xlu0 %518 }
  0x85   :  { %2412 = vmatmul.mubr.msk.f32.vlgmr.msra.gmra.mxu1 %vm47_vm2, %v2577_v4  ;;  %v532_v3 = vsel %vm530_vm3, %v519_v18, %v521_v17  ;;  %2414 = vmatpush1.msk.msra.mxu0 %vm50_vm1, %v2559_v0 }
  0x86   :  { %2416 = vmatprep.subr.msk.mxu1 %vm50_vm1, %v2594_v7  ;;  %2419 = vmatprep.subr.msk.mxu0 %vm50_vm1, %v532_v3 }
  0x87   :  { %425 = vmatprep.mubr.f32.mxu0 %v2524_v2  ;;  %2417 = vmatpush1.msk.msra.mxu1 %vm50_vm1, %v2588_v6 }
  0x88   :  { %496 = vmatprep.mubr.f32.mxu1 %v2524_v2  ;;  %v508_v1 = vpop.permute.xlu1 %507  ;;  %2415 = vmatmul.mubr.msk.f32.vlgmr.msra.gmra.mxu0 %vm47_vm2, %v2577_v4  ;;  %v517_v5 = vpop.permute.xlu0 %516 }
  0x89   :  { %2418 = vmatmul.mubr.msk.f32.vlgmr.msra.gmra.mxu1 %vm47_vm2, %v2577_v4  ;;  %v531_v0 = vsel %vm530_vm3, %v517_v5, %v519_v18  ;;  %615 = vmatprep.mubr.f32.mxu0 %v2524_v2 }
  0x8a   :  { %2420 = vmatpush1.msk.msra.mxu0 %vm50_vm1, %v531_v0  ;;  %686 = vmatprep.mubr.f32.mxu1 %v2524_v2 }
  0x8b   :  { %2373 = vperm.xlu0 %2499, %v2577_v4  }
  0x8c   :  { %v525_v6 = vpop.permute.xlu1 %524  ;;  %2421 = vmatmul.mubr.msk.f32.vlgmr.msra.gmra.mxu0 %vm47_vm2, %v508_v1  ;;  %v523_v7 = vpop.permute.xlu0 %522 }
  0x8d   :  { %v533_v19 = vsel %vm530_vm3, %v521_v17, %v523_v7  ;;  %v534_v20 = vsel %vm530_vm3, %v523_v7, %v525_v6  ;;  %757 = vmatprep.mubr.f32.mxu0 %v2524_v2 }
  0x8e   :  { %2422 = vmatprep.subr.msk.mxu1 %vm50_vm1, %v534_v20 }
  0x8f   :  { %2423 = vmatpush1.msk.msra.mxu1 %vm50_vm1, %v533_v19 }
  0x90   :  { %v529_v21 = vpop.permute.xlu1 %528  ;;  %2424 = vmatmul.mubr.msk.f32.vlgmr.msra.gmra.mxu1 %vm47_vm2, %v508_v1  ;;  %v527_v22 = vpop.permute.xlu0 %526 }
  0x91   :  { %v535_v4 = vsel %vm530_vm3, %v525_v6, %v527_v22  ;;  %v536_v23 = vsel %vm530_vm3, %v527_v22, %v529_v21  ;;  %882 = vmatprep.mubr.f32.mxu1 %v2524_v2 }
  0x92   :  { %2425 = vmatprep.subr.msk.mxu0 %vm50_vm1, %v536_v23 }
  0x93   :  { %2426 = vmatpush1.msk.msra.mxu0 %vm50_vm1, %v535_v4 }
  0x94   :  { %v788_v24 = vpop.permute.xlu1 %787  ;;  %2427 = vmatmul.mubr.msk.f32.vlgmr.msra.gmra.mxu0 %vm47_vm2, %v508_v1  ;;  %v786_v25 = vpop.permute.xlu0 %785 }
  0x95   :  { %v799_v26 = vsel %vm797_vm4, %v786_v25, %v788_v24  ;;  %953 = vmatprep.mubr.f32.mxu0 %v2524_v2 }
  0x96   :  { %2428 = vmatprep.subr.msk.mxu1 %vm50_vm1, %v799_v26 }
  0x98   :  { %v792_v27 = vpop.permute.xlu1 %791  ;;  %v790_v28 = vpop.permute.xlu0 %789 }
  0x99   :  { %v800_v29 = vsel %vm797_vm4, %v788_v24, %v790_v28  ;;  %v801_v30 = vsel %vm797_vm4, %v790_v28, %v792_v27 }
  0x9a   :  { %2431 = vmatprep.subr.msk.mxu0 %vm50_vm1, %v801_v30 }
  0x9b   :  { %2432 = vmatpush1.msk.msra.mxu0 %vm50_vm1, %v800_v29 }
  0x9c   :  { %v775_v31 = vpop.permute.xlu1 %774  ;;  %v784_v32 = vpop.permute.xlu0 %783 }
  0x9d   :  { %v798_v33 = vsel %vm797_vm4, %v784_v32, %v786_v25  ;;  %2433 = vmatmul.mubr.msk.f32.vlgmr.msra.gmra.mxu0 %vm47_vm2, %v775_v31 }
  0x9e   :  { %2429 = vmatpush1.msk.msra.mxu1 %vm50_vm1, %v798_v33  ;;  %1149 = vmatprep.mubr.f32.mxu0 %v2524_v2 }
  0x9f   :  { %2430 = vmatmul.mubr.msk.f32.vlgmr.msra.gmra.mxu1 %vm47_vm2, %v775_v31 }
  0xa0   :  { %v796_v34 = vpop.permute.xlu1 %795  ;;  %v794_v35 = vpop.permute.xlu0 %793  ;;  %1024 = vmatprep.mubr.f32.mxu1 %v2524_v2 }
  0xa1   :  { %v802_v36 = vsel %vm797_vm4, %v792_v27, %v794_v35  ;;  %v803_v37 = vsel %vm797_vm4, %v794_v35, %v796_v34 }
  0xa2   :  { %2434 = vmatprep.subr.msk.mxu1 %vm50_vm1, %v803_v37 }
  0xa3   :  { %2435 = vmatpush1.msk.msra.mxu1 %vm50_vm1, %v802_v36 }
  0xa4   :  { %v1055_v38 = vpop.permute.xlu1 %1054  ;;  %2436 = vmatmul.mubr.msk.f32.vlgmr.msra.gmra.mxu1 %vm47_vm2, %v775_v31  ;;  %v1053_v39 = vpop.permute.xlu0 %1052 }
  0xa5   :  { %v1066_v40 = vsel %vm1064_vm5, %v1053_v39, %v1055_v38  ;;  %1220 = vmatprep.mubr.f32.mxu1 %v2524_v2 }
  0xa6   :  { %2437 = vmatprep.subr.msk.mxu0 %vm50_vm1, %v1066_v40 }
  0xa8   :  { %v1042_v41 = vpop.permute.xlu1 %1041  ;;  %v1051_v42 = vpop.permute.xlu0 %1050 }
  0xa9   :  { %v1065_v43 = vsel %vm1064_vm5, %v1051_v42, %v1053_v39 }
  0xaa   :  { %2438 = vmatpush1.msk.msra.mxu0 %vm50_vm1, %v1065_v43 }
  0xab   :  { %2439 = vmatmul.mubr.msk.f32.vlgmr.msra.gmra.mxu0 %vm47_vm2, %v1042_v41 }
  0xac   :  { %v1059_v44 = vpop.permute.xlu1 %1058  ;;  %v1057_v45 = vpop.permute.xlu0 %1056  ;;  %1291 = vmatprep.mubr.f32.mxu0 %v2524_v2 }
  0xad   :  { %v1067_v46 = vsel %vm1064_vm5, %v1055_v38, %v1057_v45  ;;  %v1068_v47 = vsel %vm1064_vm5, %v1057_v45, %v1059_v44 }
  0xae   :  { %2440 = vmatprep.subr.msk.mxu1 %vm50_vm1, %v1068_v47 }
  0xaf   :  { %2441 = vmatpush1.msk.msra.mxu1 %vm50_vm1, %v1067_v46 }
  0xb0   :  { %v1063_v48 = vpop.permute.xlu1 %1062  ;;  %2442 = vmatmul.mubr.msk.f32.vlgmr.msra.gmra.mxu1 %vm47_vm2, %v1042_v41  ;;  %v1061_v49 = vpop.permute.xlu0 %1060 }
  0xb1   :  { %v1069_v50 = vsel %vm1064_vm5, %v1059_v44, %v1061_v49  ;;  %v1070_v51 = vsel %vm1064_vm5, %v1061_v49, %v1063_v48  ;;  %1416 = vmatprep.mubr.f32.mxu1 %v2524_v2 }
  0xb2   :  { %2443 = vmatprep.subr.msk.mxu0 %vm50_vm1, %v1070_v51 }
  0xb3   :  { %2444 = vmatpush1.msk.msra.mxu0 %vm50_vm1, %v1069_v50 }
  0xb4   :  { %v1322_v52 = vpop.permute.xlu1 %1321  ;;  %2445 = vmatmul.mubr.msk.f32.vlgmr.msra.gmra.mxu0 %vm47_vm2, %v1042_v41  ;;  %v1320_v53 = vpop.permute.xlu0 %1319 }
  0xb5   :  { %v1333_v54 = vsel %vm1331_vm6, %v1320_v53, %v1322_v52  ;;  %1487 = vmatprep.mubr.f32.mxu0 %v2524_v2 }
  0xb6   :  { %2446 = vmatprep.subr.msk.mxu1 %vm50_vm1, %v1333_v54 }
  0xb8   :  { %v1326_v55 = vpop.permute.xlu1 %1325  ;;  %v1324_v56 = vpop.permute.xlu0 %1323 }
  0xb9   :  { %v1334_v57 = vsel %vm1331_vm6, %v1322_v52, %v1324_v56  ;;  %v1335_v58 = vsel %vm1331_vm6, %v1324_v56, %v1326_v55 }
  0xba   :  { %2449 = vmatprep.subr.msk.mxu0 %vm50_vm1, %v1335_v58 }
  0xbb   :  { %2450 = vmatpush1.msk.msra.mxu0 %vm50_vm1, %v1334_v57 }
  0xbc   :  { %v1309_v59 = vpop.permute.xlu1 %1308  ;;  %v1318_v60 = vpop.permute.xlu0 %1317 }
  0xbd   :  { %v1332_v61 = vsel %vm1331_vm6, %v1318_v60, %v1320_v53  ;;  %2451 = vmatmul.mubr.msk.f32.vlgmr.msra.gmra.mxu0 %vm47_vm2, %v1309_v59 }
  0xbe   :  { %2447 = vmatpush1.msk.msra.mxu1 %vm50_vm1, %v1332_v61  ;;  %1683 = vmatprep.mubr.f32.mxu0 %v2524_v2 }
  0xbf   :  { %2448 = vmatmul.mubr.msk.f32.vlgmr.msra.gmra.mxu1 %vm47_vm2, %v1309_v59 }
  0xc0   :  { %v1330_v62 = vpop.permute.xlu1 %1329  ;;  %v1328_v63 = vpop.permute.xlu0 %1327  ;;  %1558 = vmatprep.mubr.f32.mxu1 %v2524_v2 }
  0xc1   :  { %v1336_v8 = vsel %vm1331_vm6, %v1326_v55, %v1328_v63  ;;  %v1337_v9 = vsel %vm1331_vm6, %v1328_v63, %v1330_v62 }
  0xc2   :  { %2452 = vmatprep.subr.msk.mxu1 %vm50_vm1, %v1337_v9 }
  0xc3   :  { %2453 = vmatpush1.msk.msra.mxu1 %vm50_vm1, %v1336_v8 }
  0xc4   :  { %v1589_v10 = vpop.permute.xlu1 %1588  ;;  %2454 = vmatmul.mubr.msk.f32.vlgmr.msra.gmra.mxu1 %vm47_vm2, %v1309_v59  ;;  %v1587_v11 = vpop.permute.xlu0 %1586 }
  0xc5   :  { %v1600_v12 = vsel %vm1598_vm7, %v1587_v11, %v1589_v10  ;;  %1754 = vmatprep.mubr.f32.mxu1 %v2524_v2 }
  0xc6   :  { %2455 = vmatprep.subr.msk.mxu0 %vm50_vm1, %v1600_v12 }
  0xc8   :  { %v1576_v13 = vpop.permute.xlu1 %1575  ;;  %v1585_v14 = vpop.permute.xlu0 %1584 }
  0xc9   :  { %v1599_v15 = vsel %vm1598_vm7, %v1585_v14, %v1587_v11 }
  0xca   :  { %2456 = vmatpush1.msk.msra.mxu0 %vm50_vm1, %v1599_v15 }
  0xcb   :  { %2457 = vmatmul.mubr.msk.f32.vlgmr.msra.gmra.mxu0 %vm47_vm2, %v1576_v13 }
  0xcc   :  { %v1593_v16 = vpop.permute.xlu1 %1592  ;;  %v1591_v17 = vpop.permute.xlu0 %1590  ;;  %1825 = vmatprep.mubr.f32.mxu0 %v2524_v2 }
  0xcd   :  { %v1601_v18 = vsel %vm1598_vm7, %v1589_v10, %v1591_v17  ;;  %v1602_v3 = vsel %vm1598_vm7, %v1591_v17, %v1593_v16 }
  0xce   :  { %2458 = vmatprep.subr.msk.mxu1 %vm50_vm1, %v1602_v3 }
  0xcf   :  { %2459 = vmatpush1.msk.msra.mxu1 %vm50_vm1, %v1601_v18 }
  0xd0   :  { %v1597_v1 = vpop.permute.xlu1 %1596  ;;  %2460 = vmatmul.mubr.msk.f32.vlgmr.msra.gmra.mxu1 %vm47_vm2, %v1576_v13  ;;  %v1595_v5 = vpop.permute.xlu0 %1594 }
  0xd1   :  { %v1603_v0 = vsel %vm1598_vm7, %v1593_v16, %v1595_v5  ;;  %v1604_v6 = vsel %vm1598_vm7, %v1595_v5, %v1597_v1  ;;  %1950 = vmatprep.mubr.f32.mxu1 %v2524_v2 }
  0xd2   :  { %2461 = vmatprep.subr.msk.mxu0 %vm50_vm1, %v1604_v6 }
  0xd3   :  { %2462 = vmatpush1.msk.msra.mxu0 %vm50_vm1, %v1603_v0 }
  0xd4   :  { %v1856_v7 = vpop.permute.xlu1 %1855  ;;  %2463 = vmatmul.mubr.msk.f32.vlgmr.msra.gmra.mxu0 %vm47_vm2, %v1576_v13  ;;  %v1854_v19 = vpop.permute.xlu0 %1853 }
  0xd5   :  { %v1867_v20 = vsel %vm1865_vm8, %v1854_v19, %v1856_v7  ;;  %2021 = vmatprep.mubr.f32.mxu0 %v2524_v2 }
  0xd6   :  { %2464 = vmatprep.subr.msk.mxu1 %vm50_vm1, %v1867_v20 }
  0xd8   :  { %v1860_v21 = vpop.permute.xlu1 %1859  ;;  %v1858_v22 = vpop.permute.xlu0 %1857 }
  0xd9   :  { %v1868_v4 = vsel %vm1865_vm8, %v1856_v7, %v1858_v22  ;;  %v1869_v23 = vsel %vm1865_vm8, %v1858_v22, %v1860_v21 }
  0xda   :  { %2467 = vmatprep.subr.msk.mxu0 %vm50_vm1, %v1869_v23 }
  0xdb   :  { %2468 = vmatpush1.msk.msra.mxu0 %vm50_vm1, %v1868_v4 }
  0xdc   :  { %v1843_v24 = vpop.permute.xlu1 %1842  ;;  %v1852_v25 = vpop.permute.xlu0 %1851 }
  0xdd   :  { %v1866_v26 = vsel %vm1865_vm8, %v1852_v25, %v1854_v19  ;;  %2469 = vmatmul.mubr.msk.f32.vlgmr.msra.gmra.mxu0 %vm47_vm2, %v1843_v24 }
  0xde   :  { %2465 = vmatpush1.msk.msra.mxu1 %vm50_vm1, %v1866_v26  ;;  %2217 = vmatprep.mubr.f32.mxu0 %v2524_v2 }
  0xdf   :  { %2466 = vmatmul.mubr.msk.f32.vlgmr.msra.gmra.mxu1 %vm47_vm2, %v1843_v24 }
  0xe0   :  { %v1864_v27 = vpop.permute.xlu1 %1863  ;;  %v1862_v28 = vpop.permute.xlu0 %1861  ;;  %2092 = vmatprep.mubr.f32.mxu1 %v2524_v2 }
  0xe1   :  { %v1870_v29 = vsel %vm1865_vm8, %v1860_v21, %v1862_v28  ;;  %v1871_v30 = vsel %vm1865_vm8, %v1862_v28, %v1864_v27 }
  0xe2   :  { %2470 = vmatprep.subr.msk.mxu1 %vm50_vm1, %v1871_v30 }
  0xe3   :  { %2471 = vmatpush1.msk.msra.mxu1 %vm50_vm1, %v1870_v29 }
  0xe4   :  { %v2123_v31 = vpop.permute.xlu1 %2122  ;;  %2472 = vmatmul.mubr.msk.f32.vlgmr.msra.gmra.mxu1 %vm47_vm2, %v1843_v24  ;;  %v2121_v32 = vpop.permute.xlu0 %2120 }
  0xe5   :  { %v2134_v33 = vsel %vm2132_vm9, %v2121_v32, %v2123_v31  ;;  %2288 = vmatprep.mubr.f32.mxu1 %v2524_v2 }
  0xe6   :  { %2473 = vmatprep.subr.msk.mxu0 %vm50_vm1, %v2134_v33 }
  0xe8   :  { %v2110_v34 = vpop.permute.xlu1 %2109  ;;  %v2119_v35 = vpop.permute.xlu0 %2118 }
  0xe9   :  { %v2133_v36 = vsel %vm2132_vm9, %v2119_v35, %v2121_v32 }
  0xea   :  { %2474 = vmatpush1.msk.msra.mxu0 %vm50_vm1, %v2133_v36 }
  0xeb   :  { %2475 = vmatmul.mubr.msk.f32.vlgmr.msra.gmra.mxu0 %vm47_vm2, %v2110_v34 }
  0xec   :  { %v2127_v37 = vpop.permute.xlu1 %2126  ;;  %v2125_v38 = vpop.permute.xlu0 %2124  ;;  %2359 = vmatprep.mubr.f32.mxu0 %v2524_v2 }
  0xed   :  { %v2135_v39 = vsel %vm2132_vm9, %v2123_v31, %v2125_v38  ;;  %v2136_v40 = vsel %vm2132_vm9, %v2125_v38, %v2127_v37 }
  0xee   :  { %2476 = vmatprep.subr.msk.mxu1 %vm50_vm1, %v2136_v40 }
  0xef   :  { %2477 = vmatpush1.msk.msra.mxu1 %vm50_vm1, %v2135_v39 }
  0xf0   :  { %v2131_v41 = vpop.permute.xlu1 %2130  ;;  %2478 = vmatmul.mubr.msk.f32.vlgmr.msra.gmra.mxu1 %vm47_vm2, %v2110_v34  ;;  %v2129_v42 = vpop.permute.xlu0 %2128 }
  0xf1   :  { %v2137_v43 = vsel %vm2132_vm9, %v2127_v37, %v2129_v42  ;;  %v2138_v44 = vsel %vm2132_vm9, %v2129_v42, %v2131_v41 }
  0xf2   :  { %2479 = vmatprep.subr.msk.mxu0 %vm50_vm1, %v2138_v44 }
  0xf3   :  { %2480 = vmatpush1.msk.msra.mxu0 %vm50_vm1, %v2137_v43 }
  0xf4   :  { %2481 = vmatmul.mubr.msk.f32.vlgmr.msra.gmra.mxu0 %vm47_vm2, %v2110_v34 }
 0x13d   :  { %v129_v45 = vpop.f32.mrf.mxu0 }
 0x13f   :  { %v131_v47 = vpop.f32.mrf.mxu0 }
 0x141   :  { %v200_v2 = vpop.f32.mrf.mxu1 }
 0x143   :  { %v202_v46 = vpop.f32.mrf.mxu1 }
 0x144   :  { %v271_v48 = vpop.f32.mrf.mxu0 }
 0x145   :  { %v356_v49 = vpop.f32.mrf.mxu1 }
 0x146   :  { %v273_v50 = vpop.f32.mrf.mxu0  ;;  %v357_v21 = vadd.f32 %v356_v49, %v129_v45 }
 0x147   :  { %v358_v51 = vpop.f32.mrf.mxu1 }
 0x148   :  { %v427_v52 = vpop.f32.mrf.mxu0  ;;  %v359_v4 = vadd.f32 %v358_v51, %v131_v47 }
 0x149   :  { %v498_v53 = vpop.f32.mrf.mxu1  ;;  %v428_v28 = vadd.f32 %v427_v52, %v200_v2 }
 0x14a   :  { %v429_v54 = vpop.f32.mrf.mxu0  ;;  %v499_v38 = vadd.f32 %v498_v53, %v271_v48 }
 0x14b   :  { %v500_v55 = vpop.f32.mrf.mxu1  ;;  %v430_v32 = vadd.f32 %v429_v54, %v202_v46 }
 0x14c   :  { %v617_v57 = vpop.f32.mrf.mxu0  ;;  %v501_v43 = vadd.f32 %v500_v55, %v273_v50  ;;  %v2374_v50 = vpop.permute.xlu0 %2373 }
 0x14d   :  { %v764_v23 = vadd.f32 %v617_v57, %v357_v21 }
 0x14e   :  { %v619_v59 = vpop.f32.mrf.mxu0 }
 0x14f   :  { %v765_v25 = vadd.f32 %v619_v59, %v359_v4 }
 0x150   :  { %v688_v56 = vpop.f32.mrf.mxu1 }
 0x151   :  { %v766_v33 = vadd.f32 %v688_v56, %v428_v28 }
 0x152   :  { %v690_v58 = vpop.f32.mrf.mxu1 }
 0x153   :  { %v767_v39 = vadd.f32 %v690_v58, %v430_v32 }
 0x154   :  { %v759_v61 = vpop.f32.mrf.mxu0 }
 0x155   :  { %v768_v44 = vadd.f32 %v759_v61, %v499_v38 }
 0x156   :  { %v761_v63 = vpop.f32.mrf.mxu0 }
 0x157   :  { %v769_v57 = vadd.f32 %v761_v63, %v501_v43 }
 0x15d   :  { %v955_v8 = vpop.f32.mrf.mxu0 }
 0x15e   :  { %v1033_v40 = vadd.f32 %v955_v8, %v766_v33 }
 0x15f   :  { %v884_v60 = vpop.f32.mrf.mxu1  ;;  %v957_v10 = vpop.f32.mrf.mxu0 }
 0x160   :  { %v1031_v26 = vadd.f32 %v884_v60, %v764_v23  ;;  %v1034_v45 = vadd.f32 %v957_v10, %v767_v39 }
 0x161   :  { %v886_v62 = vpop.f32.mrf.mxu1 }
 0x162   :  { %v1032_v30 = vadd.f32 %v886_v62, %v765_v25 }
 0x164   :  { %v1026_v9 = vpop.f32.mrf.mxu1 }
 0x165   :  { %v1035_v46 = vadd.f32 %v1026_v9, %v768_v44 }
 0x166   :  { %v1028_v11 = vpop.f32.mrf.mxu1 }
 0x167   :  { %v1036_v48 = vadd.f32 %v1028_v11, %v769_v57 }
 0x16b   :  { %v1151_v12 = vpop.f32.mrf.mxu0 }
 0x16c   :  { %v1298_v31 = vadd.f32 %v1151_v12, %v1031_v26 }
 0x16d   :  { %v1153_v14 = vpop.f32.mrf.mxu0 }
 0x16e   :  { %v1299_v35 = vadd.f32 %v1153_v14, %v1032_v30 }
 0x170   :  { %v1222_v13 = vpop.f32.mrf.mxu1 }
 0x171   :  { %v1300_v47 = vadd.f32 %v1222_v13, %v1033_v40 }
 0x172   :  { %v1224_v15 = vpop.f32.mrf.mxu1 }
 0x173   :  { %v1301_v54 = vadd.f32 %v1224_v15, %v1034_v45 }
 0x174   :  { %v1293_v16 = vpop.f32.mrf.mxu0 }
 0x175   :  { %v1302_v53 = vadd.f32 %v1293_v16, %v1035_v46 }
 0x176   :  { %v1295_v18 = vpop.f32.mrf.mxu0 }
 0x177   :  { %v1303_v10 = vadd.f32 %v1295_v18, %v1036_v48 }
 0x17d   :  { %v1489_v1 = vpop.f32.mrf.mxu0 }
 0x17e   :  { %v1567_v56 = vadd.f32 %v1489_v1, %v1300_v47 }
 0x17f   :  { %v1418_v17 = vpop.f32.mrf.mxu1  ;;  %v1491_v0 = vpop.f32.mrf.mxu0 }
 0x180   :  { %v1565_v36 = vadd.f32 %v1418_v17, %v1298_v31  ;;  %v1568_v58 = vadd.f32 %v1491_v0, %v1301_v54 }
 0x181   :  { %v1420_v3 = vpop.f32.mrf.mxu1 }
 0x182   :  { %v1566_v41 = vadd.f32 %v1420_v3, %v1299_v35 }
 0x184   :  { %v1560_v5 = vpop.f32.mrf.mxu1 }
 0x185   :  { %v1569_v13 = vadd.f32 %v1560_v5, %v1302_v53 }
 0x186   :  { %v1562_v7 = vpop.f32.mrf.mxu1 }
 0x187   :  { %v1570_v15 = vadd.f32 %v1562_v7, %v1303_v10 }
 0x18b   :  { %v1685_v6 = vpop.f32.mrf.mxu0 }
 0x18c   :  { %v1832_v42 = vadd.f32 %v1685_v6, %v1565_v36 }
 0x18d   :  { %v1687_v20 = vpop.f32.mrf.mxu0 }
 0x18e   :  { %v1833_v2 = vadd.f32 %v1687_v20, %v1566_v41 }
 0x190   :  { %v1756_v19 = vpop.f32.mrf.mxu1 }
 0x191   :  { %v1834_v8 = vadd.f32 %v1756_v19, %v1567_v56 }
 0x192   :  { %v1758_v24 = vpop.f32.mrf.mxu1 }
 0x193   :  { %v1835_v14 = vadd.f32 %v1758_v24, %v1568_v58 }
 0x194   :  { %v1827_v22 = vpop.f32.mrf.mxu0 }
 0x195   :  { %v1836_v1 = vadd.f32 %v1827_v22, %v1569_v13 }
 0x196   :  { %v1829_v29 = vpop.f32.mrf.mxu0 }
 0x197   :  { %v1837_v16 = vadd.f32 %v1829_v29, %v1570_v15 }
 0x19d   :  { %v2023_v34 = vpop.f32.mrf.mxu0 }
 0x19e   :  { %v2101_v17 = vadd.f32 %v2023_v34, %v1834_v8 }
 0x19f   :  { %v1952_v27 = vpop.f32.mrf.mxu1  ;;  %v2025_v49 = vpop.f32.mrf.mxu0 }
 0x1a0   :  { %v2099_v51 = vadd.f32 %v1952_v27, %v1832_v42  ;;  %v2102_v6 = vadd.f32 %v2025_v49, %v1835_v14 }
 0x1a1   :  { %v1954_v37 = vpop.f32.mrf.mxu1 }
 0x1a2   :  { %v2100_v60 = vadd.f32 %v1954_v37, %v1833_v2 }
 0x1a4   :  { %v2094_v52 = vpop.f32.mrf.mxu1 }
 0x1a5   :  { %v2103_v0 = vadd.f32 %v2094_v52, %v1836_v1 }
 0x1a6   :  { %v2096_v55 = vpop.f32.mrf.mxu1 }
 0x1a7   :  { %v2104_v5 = vadd.f32 %v2096_v55, %v1837_v16 }
 0x1ab   :  { %v2219_v59 = vpop.f32.mrf.mxu0 }
 0x1ac   :  { %v2366_v62 = vadd.f32 %v2219_v59, %v2099_v51 }
 0x1ad   :  { %v2221_v12 = vpop.f32.mrf.mxu0 }
 0x1ae   :  { %v2367_v61 = vadd.f32 %v2221_v12, %v2100_v60  ;;  %v2376_v3 = vadd.f32 %v2374_v50, %v2366_v62 }
 0x1b0   :  { %v2377_v63 = vadd.f32 %v2374_v50, %v2367_v61  ;;  %v2290_v9 = vpop.f32.mrf.mxu1 }
 0x1b1   :  { %v2368_v20 = vadd.f32 %v2290_v9, %v2101_v17 }
 0x1b2   :  { %v2388_v21 = vcombine.low %v2376_v3, %v2377_v63  ;;  %v2292_v11 = vpop.f32.mrf.mxu1 }
 0x1b3   :  { %v2369_v19 = vadd.f32 %v2292_v11, %v2102_v6  ;;  %v2378_v4 = vadd.f32 %v2374_v50, %v2368_v20 }
 0x1b4   :  { %2394 = vst [vmem:[%s2881_s2] sm:$0xff] %v2388_v21  ;;  %v2361_v18 = vpop.f32.mrf.mxu0 }
 0x1b5   :  { %v2379_v23 = vadd.f32 %v2374_v50, %v2369_v19  ;;  %v2370_v24 = vadd.f32 %v2361_v18, %v2103_v0 }
 0x1b6   :  { %v2363_v25 = vpop.f32.mrf.mxu0 }
 0x1b7   :  { %v2389_v26 = vcombine.low %v2378_v4, %v2379_v23  ;;  %v2371_v7 = vadd.f32 %v2363_v25, %v2104_v5  ;;  %v2380_v22 = vadd.f32 %v2374_v50, %v2370_v24 }
 0x1b9   :  { %2395 = vst [vmem:[%s2881_s2 + $0x8] sm:$0xff] %v2389_v26  ;;  %v2381_v27 = vadd.f32 %v2374_v50, %v2371_v7 }
 0x1bb   :  { %v2390_v28 = vcombine.low %v2380_v22, %v2381_v27 }
 0x1bd   :  { %2396 = vst [vmem:[%s2881_s2 + $0x10] sm:$0xff] %v2390_v28 }

</bundles_post_ra>
